<compile_context>
chip_gen: v7x
topology: tpu7x:2x2x1
jax: 0.10.0
libtpu: 0.0.40
codegen_flags: <defaults>
</compile_context>

<pallas_src>
import jax
import jax.numpy as jnp
from jax.experimental import pallas as pl
from jax.experimental.pallas import tpu as pltpu


def _round_up(v, m):
    return (v + m - 1) // m * m


# ----------------------------------------------------------------------------
# Pallas kernels
# ----------------------------------------------------------------------------
def qkv_kernel(x_ref, w_ref, b_ref, out_ref):
    # x_ref: (1, TN, Cin) bf16, w_ref: (Cin, 3*CoP) bf16, b_ref: (1, 3*CoP) f32
    out_ref[0] = (
        jnp.dot(x_ref[0], w_ref[...], preferred_element_type=jnp.float32)
        + b_ref[...]
    ).astype(out_ref.dtype)


def pt_attn_kernel(q_ref, nk_ref, nv_ref, rel_ref,
                   vecs_ref, pe_ref, w_pe2_ref, w_a1_ref, w_a2_ref,
                   y_ref):
    # Per grid step: one batch element, TN query points, all K neighbors.
    # q_ref  : (1, TN, CoP)      f32
    # nk/nv  : (1, K, TN, CoP)   bf16 (grouped key / value features)
    # rel    : (1, K, TN, 3)     f32  (relative neighbor coordinates)
    # vecs   : (8, CoP)          f32  rows: a1_s,a1_b,a2_s,a2_b,b_pe2,b_a2
    # pe     : (8, 3)            f32  rows 0:3 w_pe1^T, row3 pe_s, row4 pe_b
    # w_pe2  : (3, CoP) bf16, w_a1/w_a2: (CoP, CoP) bf16
    K = nk_ref.shape[1]

    q = q_ref[0]                                   # (TN, CoP) f32
    vecs = vecs_ref[...]
    a1_s, a1_b = vecs[0:1, :], vecs[1:2, :]
    a2_s, a2_b = vecs[2:3, :], vecs[3:4, :]
    b_pe2, b_a2 = vecs[4:5, :], vecs[5:6, :]

    pe = pe_ref[...]
    w_pe1 = pe[0:3, :]                             # (3, 3)
    pe_s, pe_b = pe[3:4, :], pe[4:5, :]            # (1, 3)

    w_pe2 = w_pe2_ref[...]
    w_a1 = w_a1_ref[...]
    w_a2 = w_a2_ref[...]

    a_ks = []
    nv_ks = []
    for kk in range(K):                            # static unroll over neighbors
        rel_k = rel_ref[0, kk]                     # (TN, 3)  f32

        # to_pos_enc: Conv2d(3,3,no bias) -> BN(3) -> ReLU -> Conv2d(3,Co)
        h = jnp.dot(rel_k, w_pe1, preferred_element_type=jnp.float32)
        h = jnp.maximum(h * pe_s + pe_b, 0.0)
        n_r = jnp.dot(h.astype(jnp.bfloat16), w_pe2,
                      preferred_element_type=jnp.float32) + b_pe2   # (TN, CoP)

        # value + position encoding
        nv_ks.append(nv_ref[0, kk].astype(jnp.float32) + n_r)

        # to_attn: BN -> ReLU -> Conv2d(no bias) -> BN -> ReLU -> Conv2d
        a = q - nk_ref[0, kk].astype(jnp.float32) + n_r
        a = jnp.maximum(a * a1_s + a1_b, 0.0)
        a = jnp.dot(a.astype(jnp.bfloat16), w_a1,
                    preferred_element_type=jnp.float32)
        a = jnp.maximum(a * a2_s + a2_b, 0.0)
        a = jnp.dot(a.astype(jnp.bfloat16), w_a2,
                    preferred_element_type=jnp.float32) + b_a2
        a_ks.append(a)

    # softmax over the K neighbors (== torch softmax(dim=-1) on (B,Co,N,K))
    m = a_ks[0]
    for kk in range(1, K):
        m = jnp.maximum(m, a_ks[kk])
    e_ks = [jnp.exp(a - m) for a in a_ks]
    denom = e_ks[0]
    for kk in range(1, K):
        denom = denom + e_ks[kk]
    inv = pl.reciprocal(denom, approx=True)

    # weighted sum over neighbors
    acc = e_ks[0] * nv_ks[0]
    for kk in range(1, K):
        acc = acc + e_ks[kk] * nv_ks[kk]
    y_ref[0] = (acc * inv).astype(y_ref.dtype)


# ----------------------------------------------------------------------------
# Wrappers
# ----------------------------------------------------------------------------
_VMEM_LIMIT = 48 * 1024 * 1024   # raised vs scoped default; < v7x physical 64MiB


def qkv_project(x_bf, w_qkv, b_qkv, *, tn):
    # x_bf: (B, NP, Cin) bf16, w_qkv: (Cin, 3*CoP) bf16, b_qkv: (1, 3*CoP) f32
    B, NP, Cin = x_bf.shape
    C3 = w_qkv.shape[1]
    return pl.pallas_call(
        qkv_kernel,
        out_shape=jax.ShapeDtypeStruct((B, NP, C3), jnp.float32),
        grid=(B, NP // tn),
        in_specs=[
            pl.BlockSpec((1, tn, Cin), lambda b, t: (b, t, 0)),
            pl.BlockSpec((Cin, C3), lambda b, t: (0, 0)),
            pl.BlockSpec((1, C3), lambda b, t: (0, 0)),
        ],
        out_specs=pl.BlockSpec((1, tn, C3), lambda b, t: (b, t, 0)),
        compiler_params=pltpu.CompilerParams(
            dimension_semantics=("parallel", "parallel"),
            vmem_limit_bytes=_VMEM_LIMIT),
    )(x_bf, w_qkv, b_qkv)


def pt_attention(q, n_k, n_v, rel, weights, *, tn):
    # q: (B, NP, CoP) f32; n_k/n_v: (B, K, NP, CoP) bf16; rel: (B, K, NP, 3) f32
    B, NP, CoP = q.shape
    K = n_k.shape[1]
    vecs, pe_small, w_pe2, w_a1, w_a2 = weights

    return pl.pallas_call(
        pt_attn_kernel,
        out_shape=jax.ShapeDtypeStruct((B, NP, CoP), jnp.float32),
        grid=(B, NP // tn),
        in_specs=[
            pl.BlockSpec((1, tn, CoP), lambda b, t: (b, t, 0)),
            pl.BlockSpec((1, K, tn, CoP), lambda b, t: (b, 0, t, 0)),
            pl.BlockSpec((1, K, tn, CoP), lambda b, t: (b, 0, t, 0)),
            pl.BlockSpec((1, K, tn, 3), lambda b, t: (b, 0, t, 0)),
            pl.BlockSpec((8, CoP), lambda b, t: (0, 0)),
            pl.BlockSpec((8, 3), lambda b, t: (0, 0)),
            pl.BlockSpec((3, CoP), lambda b, t: (0, 0)),
            pl.BlockSpec((CoP, CoP), lambda b, t: (0, 0)),
            pl.BlockSpec((CoP, CoP), lambda b, t: (0, 0)),
        ],
        out_specs=pl.BlockSpec((1, tn, CoP), lambda b, t: (b, t, 0)),
        compiler_params=pltpu.CompilerParams(
            dimension_semantics=("parallel", "parallel"),
            vmem_limit_bytes=_VMEM_LIMIT),
    )(q, n_k, n_v, rel, vecs, pe_small, w_pe2, w_a1, w_a2)


# ----------------------------------------------------------------------------
# Glue: KNN + grouping (pointops.QueryAndGroup equivalent)
# ----------------------------------------------------------------------------
def knn_indices(p, k):
    # p: (B, N, 3) -> (B, N, K) indices of K nearest points (self included).
    # TODO(synk): for large N, block this O(N^2) KNN (tiled running top-K) and
    # fuse the gather into the attention kernel via scalar-prefetched indices.
    d2 = jnp.sum((p[:, :, None, :] - p[:, None, :, :]) ** 2, axis=-1)
    _, idx = jax.lax.top_k(-d2, k)
    return idx


def group(feat, idx):
    # feat: (B, N, C), idx: (B, N, K) -> (B, N, K, C)
    return jax.vmap(lambda f, i: f[i])(feat, idx)


def group_kfirst(feat, idx):
    # feat: (B, N, C), idx: (B, N, K) -> (B, K, N, C)  (neighbor-major layout)
    return jax.vmap(lambda f, i: f[i.T])(feat, idx)


# ----------------------------------------------------------------------------
# Parameter packing (pad Co -> CoP=128 lanes, fold BN, consolidate vectors)
# ----------------------------------------------------------------------------
def pack_params(raw, Co):
    CoP = _round_up(Co, 128)
    (wq, bq, wk, bk, wv, bv,
     w_pe1, pe_s, pe_b, w_pe2, b_pe2,
     a1_s, a1_b, w_a1, a2_s, a2_b, w_a2, b_a2) = raw

    def pad_cols(m, cols):
        return jnp.pad(m, ((0, 0), (0, cols - m.shape[1])))

    w_qkv = jnp.concatenate(
        [pad_cols(wq.T, CoP), pad_cols(wk.T, CoP), pad_cols(wv.T, CoP)], axis=1)
    b_qkv = jnp.concatenate(
        [pad_cols(bq[None, :], CoP), pad_cols(bk[None, :], CoP),
         pad_cols(bv[None, :], CoP)], axis=1)

    vecs = jnp.zeros((8, CoP), jnp.float32)
    vecs = vecs.at[:6, :Co].set(
        jnp.stack([a1_s, a1_b, a2_s, a2_b, b_pe2, b_a2], axis=0))

    pe_small = jnp.zeros((8, 3), jnp.float32)
    pe_small = pe_small.at[0:3, :].set(w_pe1.T)
    pe_small = pe_small.at[3, :].set(pe_s)
    pe_small = pe_small.at[4, :].set(pe_b)

    w_pe2_p = pad_cols(w_pe2.T, CoP).astype(jnp.bfloat16)          # (3, CoP)
    w_a1_p = jnp.zeros((CoP, CoP), jnp.float32
                       ).at[:Co, :Co].set(w_a1.T).astype(jnp.bfloat16)
    w_a2_p = jnp.zeros((CoP, CoP), jnp.float32
                       ).at[:Co, :Co].set(w_a2.T).astype(jnp.bfloat16)

    return (w_qkv.astype(jnp.bfloat16), b_qkv, vecs, pe_small,
            w_pe2_p, w_a1_p, w_a2_p, CoP)


# ----------------------------------------------------------------------------
# Full layer forward
# ----------------------------------------------------------------------------
def point_transformer_layer(p, x, packed, *, K, Co):
    """p: (B,N,3) f32, x: (B,N,Cin) f32 -> y: (B,N,Co) f32."""
    (w_qkv, b_qkv, vecs, pe_small, w_pe2, w_a1, w_a2, CoP) = packed
    B, N, _ = x.shape

    TN = min(128, _round_up(N, 16))        # query-tile size (VMEM-safe on v7x)
    NP = _round_up(N, TN)

    # q, k, v projections (tiled Pallas matmul kernel, bf16 operands)
    x_pad = jnp.pad(x, ((0, 0), (0, NP - N), (0, 0))).astype(jnp.bfloat16)
    qkv = qkv_project(x_pad, w_qkv, b_qkv, tn=TN)          # (B, NP, 3*CoP) f32
    q = qkv[..., :CoP]
    kf = qkv[..., CoP:2 * CoP]
    vf = qkv[..., 2 * CoP:]

    # key_grouper / value_grouper (KNN + gather, plain JAX glue)
    # TODO(synk): pointops.QueryAndGroup CUDA kernel has no direct Pallas
    # equivalent; fuse this gather into pt_attn via PrefetchScalarGridSpec +
    # manual DMA to avoid the K-fold HBM expansion for production sizes.
    idx = knn_indices(p, K)
    n_k = group_kfirst(kf, idx)                            # (B, K, N, CoP)
    n_v = group_kfirst(vf, idx)
    rel = group_kfirst(p, idx) - p[:, None, :, :]          # (B, K, N, 3)

    padN = ((0, 0), (0, 0), (0, NP - N), (0, 0))
    n_k = jnp.pad(n_k, padN).astype(jnp.bfloat16)
    n_v = jnp.pad(n_v, padN).astype(jnp.bfloat16)
    rel = jnp.pad(rel, padN)

    y = pt_attention(q, n_k, n_v, rel,
                     (vecs, pe_small, w_pe2, w_a1, w_a2), tn=TN)
    return y[:, :N, :Co]


# ----------------------------------------------------------------------------
# Pure-JAX f32 reference (unpadded weights)
# ----------------------------------------------------------------------------
def reference_forward(p, x, raw, K):
    (wq, bq, wk, bk, wv, bv,
     w_pe1, pe_s, pe_b, w_pe2, b_pe2,
     a1_s, a1_b, w_a1, a2_s, a2_b, w_a2, b_a2) = raw

    q = x @ wq.T + bq
    kf = x @ wk.T + bk
    vf = x @ wv.T + bv
    idx = knn_indices(p, K)
    n_k = group(kf, idx)
    n_v = group(vf, idx)
    rel = group(p, idx) - p[:, :, None, :]

    h = jnp.maximum((rel @ w_pe1.T) * pe_s + pe_b, 0.0)
    n_r = h @ w_pe2.T + b_pe2
    n_v = n_v + n_r
    a = q[:, :, None, :] - n_k + n_r
    a = jnp.maximum(a * a1_s + a1_b, 0.0)
    a = a @ w_a1.T
    a = jnp.maximum(a * a2_s + a2_b, 0.0)
    a = a @ w_a2.T + b_a2
    a = jax.nn.softmax(a, axis=2)          # softmax over neighbors K
    return jnp.sum(n_v * a, axis=2)


# ----------------------------------------------------------------------------
# Deterministic synthetic parameters
# ----------------------------------------------------------------------------
def bn_affine(key, c, eps=1e-5):
    k1, k2, k3, k4 = jax.random.split(key, 4)
    gamma = 1.0 + 0.1 * jax.random.normal(k1, (c,), jnp.float32)
    beta = 0.1 * jax.random.normal(k2, (c,), jnp.float32)
    mean = 0.1 * jax.random.normal(k3, (c,), jnp.float32)
    var = 1.0 + 0.1 * jax.random.uniform(k4, (c,), jnp.float32)
    scale = gamma / jnp.sqrt(var + eps)
    shift = beta - mean * scale
    return scale, shift


def conv_w(key, cout, cin):
    return 0.1 * jax.random.normal(key, (cout, cin), jnp.float32)


if __name__ == "__main__":
    B, N, Cin, Co, K = 2, 16, 8, 16, 4

    key = jax.random.PRNGKey(0)
    ks = jax.random.split(key, 20)

    # inputs
    p = jax.random.normal(ks[0], (B, N, 3), jnp.float32)
    x = jax.random.normal(ks[1], (B, N, Cin), jnp.float32)

    # to_query / to_key / to_value (Conv1d k=1)
    wq = conv_w(ks[2], Co, Cin); bq = 0.1 * jax.random.normal(ks[3], (Co,), jnp.float32)
    wk = conv_w(ks[4], Co, Cin); bk = 0.1 * jax.random.normal(ks[5], (Co,), jnp.float32)
    wv = conv_w(ks[6], Co, Cin); bv = 0.1 * jax.random.normal(ks[7], (Co,), jnp.float32)

    # to_pos_enc: Conv2d(3,3,no bias) -> BN(3) -> ReLU -> Conv2d(3,Co)
    w_pe1 = conv_w(ks[8], 3, 3)
    pe_s, pe_b = bn_affine(ks[9], 3)
    w_pe2 = conv_w(ks[10], Co, 3)
    b_pe2 = 0.1 * jax.random.normal(ks[11], (Co,), jnp.float32)

    # to_attn: BN(Co) -> ReLU -> Conv2d(no bias) -> BN(Co) -> ReLU -> Conv2d
    a1_s, a1_b = bn_affine(ks[12], Co)
    w_a1 = conv_w(ks[13], Co, Co)
    a2_s, a2_b = bn_affine(ks[14], Co)
    w_a2 = conv_w(ks[15], Co, Co)
    b_a2 = 0.1 * jax.random.normal(ks[16], (Co,), jnp.float32)

    raw = (wq, bq, wk, bk, wv, bv,
           w_pe1, pe_s, pe_b, w_pe2, b_pe2,
           a1_s, a1_b, w_a1, a2_s, a2_b, w_a2, b_a2)
    packed = pack_params(raw, Co)

    y = point_transformer_layer(p, x, packed, K=K, Co=Co)
    y = jax.block_until_ready(y)

    y_ref = reference_forward(p, x, raw, K)
    assert y.shape == (B, N, Co)
    err = float(jnp.max(jnp.abs(y - y_ref)))
    assert err < 5e-2, f"max abs err {err}"

    print("KERNEL_OK")
</pallas_src>

<mosaic_0001>
module attributes {stable_mosaic.version = 11 : i64} {
  func.func @qkv_kernel(%arg0: i32, %arg1: i32, %arg2: memref<1x16x8xbf16, #tpu.memory_space<vmem>>, %arg3: memref<8x384xbf16, #tpu.memory_space<vmem>>, %arg4: memref<1x384xf32, #tpu.memory_space<vmem>>, %arg5: memref<1x16x384xf32, #tpu.memory_space<vmem>>) attributes {dimension_semantics = [#tpu.dimension_semantics<parallel>, #tpu.dimension_semantics<parallel>], iteration_bounds = array<i64: 2, 1>, scalar_prefetch = 0 : i64, scratch_operands = 0 : i64, tpu.core_type = #tpu.core_type<tc>, window_params = [{transform_indices = @transform_0, window_bounds = array<i64: 1, 16, 8>}, {pipeline_mode = #tpu.pipeline_mode<synchronous>, transform_indices = @transform_1, window_bounds = array<i64: 8, 384>}, {pipeline_mode = #tpu.pipeline_mode<synchronous>, transform_indices = @transform_2, window_bounds = array<i64: 1, 384>}, {transform_indices = @transform_3, window_bounds = array<i64: 1, 16, 384>}]} {
    %c0 = arith.constant 0 : index
    %c0_0 = arith.constant 0 : index
    %c0_1 = arith.constant 0 : index
    %0 = vector.load %arg2[%c0, %c0_0, %c0_1] : memref<1x16x8xbf16, #tpu.memory_space<vmem>>, vector<1x16x8xbf16>
    %1 = vector.shape_cast %0 : vector<1x16x8xbf16> to vector<16x8xbf16>
    %c0_2 = arith.constant 0 : index
    %c0_3 = arith.constant 0 : index
    %2 = vector.load %arg3[%c0_2, %c0_3] : memref<8x384xbf16, #tpu.memory_space<vmem>>, vector<8x384xbf16>
    %cst = arith.constant dense<0.000000e+00> : vector<16x384xf32>
    %3 = tpu.matmul %1, %2, %cst {dimension_numbers = #tpu.dot_dimension_numbers<[1], [0], [0], [1], [0, 0, 1, 1], [], []>} : vector<16x8xbf16>, vector<8x384xbf16>, vector<16x384xf32> -> vector<16x384xf32>
    %c0_4 = arith.constant 0 : index
    %c0_5 = arith.constant 0 : index
    %4 = vector.load %arg4[%c0_4, %c0_5] : memref<1x384xf32, #tpu.memory_space<vmem>>, vector<1x384xf32>
    %5 = vector.broadcast %4 : vector<1x384xf32> to vector<16x384xf32>
    %6 = arith.addf %3, %5 : vector<16x384xf32>
    %c0_6 = arith.constant 0 : index
    %c0_7 = arith.constant 0 : index
    %c0_8 = arith.constant 0 : index
    %7 = vector.load %arg5[%c0_6, %c0_7, %c0_8] : memref<1x16x384xf32, #tpu.memory_space<vmem>>, vector<1x16x384xf32>
    %8 = vector.shape_cast %7 : vector<1x16x384xf32> to vector<16x384xf32>
    %9 = vector.shape_cast %6 : vector<16x384xf32> to vector<1x16x384xf32>
    tpu.vector_store %arg5[%c0_6, %c0_7, %c0_8], %9 {strides = array<i32>} : memref<1x16x384xf32, #tpu.memory_space<vmem>>, vector<1x16x384xf32>,
    return
  }
  func.func @transform_0(%arg0: i32, %arg1: i32) -> (i32, i32, i32) {
    %c0_i32 = arith.constant 0 : i32
    %c0_i32_0 = arith.constant 0 : i32
    return %arg0, %arg1, %c0_i32 : i32, i32, i32
  }
  func.func @transform_1(%arg0: i32, %arg1: i32) -> (i32, i32) {
    %c0_i32 = arith.constant 0 : i32
    %c0_i32_0 = arith.constant 0 : i32
    %c0_i32_1 = arith.constant 0 : i32
    return %c0_i32, %c0_i32_0 : i32, i32
  }
  func.func @transform_2(%arg0: i32, %arg1: i32) -> (i32, i32) {
    %c0_i32 = arith.constant 0 : i32
    %c0_i32_0 = arith.constant 0 : i32
    %c0_i32_1 = arith.constant 0 : i32
    return %c0_i32, %c0_i32_0 : i32, i32
  }
  func.func @transform_3(%arg0: i32, %arg1: i32) -> (i32, i32, i32) {
    %c0_i32 = arith.constant 0 : i32
    %c0_i32_0 = arith.constant 0 : i32
    return %arg0, %arg1, %c0_i32 : i32, i32, i32
  }
}

</mosaic_0001>

<bundles_post_ra>
// kernel: tpu_custom_call.1
= control target key start
LH: loop header
LB: loop body
LE: loop exit
PB: predicated region body
PF: predicated region fallthrough
CT: control target
= control target key end

     0   :  { %8 = vsyncpa [#allocation3], 0  ;;  %s761_s0 = inlined_call_operand.vmem [shape: bf16[2,16,8], index: 0, kind: input, shape index: {}]   ;;  %s762_s1 = inlined_call_operand.vmem [shape: bf16[8,384], index: 1, kind: input, shape index: {}]   ;;  %s763_s2 = inlined_call_operand.vmem [shape: f32[1,384], index: 2, kind: input, shape index: {}]   ;;  %s764_s3 = inlined_call_operand.hbm [shape: f32[2,16,384], index: 3, kind: output, shape index: {}]  }
   0x1   :  { %10 = vsyncpa [#allocation3 + $0x1], 0  ;;  %s633_s12 = smov 0   ;;  %s635_s13 = smov 0  }
   0x2   :  { %s637_s14 = smov 0   ;;  %s639_s15 = smov 0  }
   0x3   :  { %s641_s16 = smov 0   ;;  %s643_s17 = smov 0  }
   0x4 LB: > { %s435_s18 = sadd.s32 4294967295, %s605_s17   ;;  %s436_s19 = sadd.s32 4294967294, %s605_s17   ;;  %s605_s17 = sphi %s643_s17, %s16_s17   ;;  %s601_s16 = sphi %s641_s16, %s771_s16   ;;  %s597_s15 = sphi %s639_s15, %s770_s15   ;;  %s593_s14 = sphi %s637_s14, %s769_s14   ;;  %s589_s13 = sphi %s635_s13, %s768_s13   ;;  %s585_s12 = sphi %s633_s12, %s767_s12  }
   0x5   : > { %s28_s20 = sadd.s32 1, %s601_s16  ;;  %s107_s21 = sadd.s32 1, %s593_s14 }
   0x6   : > { %p30_p0 = scmp.ge.s32.totalorder %s28_s20, 2  ;;  %p117_p1 = scmp.ne.s32.totalorder %s593_s14, %s589_s13 }
   0x7   : > { %p118_p2 = scmp.eq.s32.totalorder %s435_s18, 1  ;;  %p123_p3 = scmp.ne.s32.totalorder %s589_s13, %s585_s12 }
   0x8   : > { %s773_s20 = smov (%p30_p0, %s28_s20), 0  ;;  %p124_p5 = scmp.eq.s32.totalorder %s436_s19, 1 }
   0x9   : > { %p673_p4 = por %p118_p2, %p117_p1  ;;  %s102_s23 = ssub.s32 %s601_s16, %s773_s20 }
   0xa   : > { %p439_p6 = scmp.ge.s32.totalorder %s605_s17, 1  ;;  %p105_p7 = scmp.eq.s32.totalorder %s102_s23, 0 }
   0xb   : > { %p680_p8 = por %p124_p5, %p123_p3  ;;  %p161_p9 = scmp.lt.s32.totalorder %s605_s17, 3 }
   0xc   : > { %s686_s25 = scalar_select %p105_p7, %s593_s14, %s107_s21  }
   0xd   : > { %p162_p10 = pnand %p439_p6, %p161_p9 }
   0xe   : > { %v203_v0 = vld [vmem:[%s762_s1] sm:$0xff] (!%p162_p10)  ;;  %vm239_vm0 = vcmask (!%p162_p10), 1043456   ;;  %v607_v2 = vmov (!%p162_p10), 0.0   ;;  %v525_v4 = vld [vmem:[%s762_s1 + $0x8] ss:$0 sps:$4 sm:$0xff] (!%p162_p10)   ;;  %v608_v5 = vmov (!%p162_p10), 0   ;;  %v207_v9 = vlaneseq (!%p162_p10) }
   0xf   : > { %165 = sbr.rel (%p162_p10) target bundleno = 259 (0x103), region = 32  ;;  %v444_v1 = vcombine.high (!%p162_p10), %v203_v0, %v203_v0  ;;  %455 = vmatprep.subr.bf16.mxu1 (!%p162_p10), %v607_v2  ;;  %v443_v3 = vcombine.low (!%p162_p10), %v203_v0, %v203_v0  ;;  %281 = vmatprep.mubr.bf16.mxu0 (!%p162_p10), %v608_v5  ;;  %p190_p11 = scmp.lt.s32.totalorder (!%p162_p10), %s597_s15, 1  ;;  %vm609_vm1 = vmmov (!%p162_p10), 0   ;;  %v247_v7 = vsel (!%p162_p10), %vm239_vm0, %v525_v4, 0  ;;  %v205_v13 = vld [vmem:[%s763_s2] sm:$0x7] (!%p162_p10) }
  0x10   : > { %457 = vmatprep.mubr.msk.bf16.mxu1 (!%p162_p10), %vm609_vm1, %v607_v2  ;;  %456 = vmatpush3.bf16.msra.mxu1 (!%p162_p10), %v247_v7  ;;  %vm235_vm2 = vcmask (!%p162_p10), 64512   ;;  %v208_v10 = vshrl.u32 (!%p162_p10), %v207_v9, 7  ;;  %s186_s8 = sand.u32 (!%p162_p10), 1, %s589_s13   ;;  %s462_s18 = smul.u32 (!%p162_p10), 768, %s597_s15 }
  0x11   : > { %446 = vmatprep.subr.msk.bf16.mxu0 (!%p162_p10), %vm239_vm0, %v444_v1  ;;  %v241_v6 = vsel (!%p162_p10), %vm239_vm0, %v443_v3, 0  ;;  %s461_s11 = smul.u32 (!%p162_p10), 48, %s186_s8  ;;  %s715_s27 = scalar_lea.sflag (!%p162_p10), [#allocation3], %s186_s8 }
  0x12   : > { %250 = vmatpush1.bf16.msra.mxu0 (!%p162_p10), %v241_v6  ;;  %v209_v11 = vsub.s32 (!%p162_p10), 0, %v208_v10  ;;  %v217_v12 = vsub.s32 (!%p162_p10), 2, %v208_v10  ;;  %v213_v14 = vsub.s32 (!%p162_p10), 1, %v208_v10  ;;  %s711_s26 = scalar_lea.hbm (!%p162_p10), %s764_s3, %s462_s18  ;;  %s610_s29 = smov (!%p162_p10), [#allocation2]  }
  0x13   : > { %s188_s19 = scalar_lea.vmem (!%p162_p10), [#allocation2], %s461_s11 }
  0x14   : > { %v210_v15 = vrot.slane (!%p162_p10), %v205_v13, %v209_v11  ;;  %v218_v16 = vrot.slane (!%p162_p10), %v205_v13, %v217_v12  ;;  %v214_v17 = vrot.slane (!%p162_p10), %v205_v13, %v213_v14  ;;  %s356_s21 = sshll.u32 (!%p162_p10), %s188_s19, 4  ;;  %s706_s21 = int_to_ptr.vmem [resolvable:$true] %s356_s21 }
  0x15   : > { %s527_s28 = scalar_lea.vmem (!%p162_p10), %s706_s21, 768 }
  0x16   : > { %s191_s30 = scalar_select %p190_p11, %s597_s15, 1 }
  0x17   : > { %p528_p12 = scmp.ne.s32.totalorder %s706_s21, %s527_s28 }
  0x18   : > { %s452_s4 = sshll.u32 %s191_s30, 3  ;;  %s531_s30 = sshll.u32 %s610_s29, 4  ;;  %s532_s30 = int_to_ptr.vmem [resolvable:$false] %s531_s30 }
  0x19   : > { %s197_s7 = scalar_lea.vmem %s761_s0, %s452_s4  ;;  %p529_p13 = pnand %p528_p12, %p673_p4 }
  0x1a   : > { %v526_v8 = vld [vmem:[%s197_s7] sm:$0xff]   ;;  %s533_s4 = scalar_lea.vmem %s532_s30, 1536  ;;  %p534_p1 = scmp.lt.s32.totalorder %s706_s21, %s532_s30 }
  0x1b   : > { %447 = vmatmul.mubr.msk.bf16.vlgmr.msra.gmra.mrb[0].mxu0 %vm235_vm2, %v526_v8  ;;  %458 = vmatmul.mubr.msk.bf16.vlgmr.msra.gmra.mrb[0].mxu1 %vm235_vm2, %v526_v8  ;;  %p530_p0 = pneg %p529_p13  ;;  %p535_p2 = scmp.lt.s32.totalorder %s533_s4, %s527_s28 }
  0x1d   : > { %p536_p3 = por %p535_p2, %p534_p1 }
  0x1f   : > { %p537_p5 = pnand %p536_p3, %p530_p0 }
  0xee   : > { %v283_v18 = vpop.f32.mrb[0].mxu0  ;;  %v326_v19 = vpop.f32.mrb[0].mxu1 }
  0xef   : > { %v284_v20 = vadd.f32 %v283_v18, %v210_v15  ;;  %v327_v21 = vadd.f32 %v326_v19, %v218_v16  ;;  %v285_v22 = vpop.f32.mrb[1].mxu0  ;;  %v459_v23 = vpop.f32.mrb[1].mxu1 }
  0xf0   : > { %v286_v24 = vadd.f32 %v285_v22, %v214_v17  ;;  %v287_v25 = vpop.f32.mrb[2].mxu0  ;;  %v329_v26 = vpop.f32.mrb[2].mxu1 }
  0xf1   : > { %333 = vst [vmem:[%s188_s19] sm:$0xff] %v284_v20  ;;  %335 = vst [vmem:[%s188_s19 + $0x10] sm:$0xff] %v327_v21  ;;  %v288_v27 = vadd.f32 %v287_v25, %v210_v15  ;;  %v330_v28 = vadd.f32 %v329_v26, %v218_v16  ;;  %v289_v29 = vpop.f32.mrb[3].mxu0  ;;  %v460_v30 = vpop.f32.mrb[3].mxu1 }
  0xf2   : > { %334 = vst [vmem:[%s188_s19 + $0x8] sm:$0xff] %v286_v24  ;;  %v290_v31 = vadd.f32 %v289_v29, %v214_v17 }
  0xf3   : > { %336 = vst [vmem:[%s188_s19 + $0x18] sm:$0xff] %v288_v27  ;;  %338 = vst [vmem:[%s188_s19 + $0x28] sm:$0xff] %v330_v28 }
  0xf4   : > { %337 = vst [vmem:[%s188_s19 + $0x20] sm:$0xff] %v290_v31 }
  0xf5   : > { %540 = shalt.err (!%p537_p5)
}
  0xf6   : > { %s541_s5 = scalar_lea.hbm %s711_s26, 768  ;;  %s545_s8 = scalar_lea.hbm %s764_s3, 1536 }
  0xf7   : > { %p542_p6 = scmp.ne.s32.totalorder %s711_s26, %s541_s5  ;;  %p546_p10 = scmp.lt.u32.totalorder %s711_s26, %s764_s3 }
  0xf8   : > { %p547_p11 = scmp.lt.u32.totalorder %s545_s8, %s541_s5  ;;  %p549_p13 = scmp.lt.u32.totalorder %s541_s5, %s711_s26 }
  0xf9   : > { %p543_p7 = pnand %p542_p6, %p673_p4 }
  0xfa   : > { %p548_p12 = por %p547_p11, %p546_p10 }
  0xfb   : > { %p544_p9 = pneg %p543_p7 }
  0xfc   : > { %p550_p0 = por %p549_p13, %p548_p12 }
  0xfe   : > { %p551_p1 = pnand %p550_p0, %p544_p9 }
 0x100   : > { %554 = shalt.err (!%p551_p1)
}
 0x101   : > { %s611_s11 = smov 384   ;;  %s612_s18 = smov 24  }
 0x102   : > { %463 = dma.vmem_to_hbm [thread:$0]  (%p673_p4), %s706_s21, 768, %s711_s26, %s715_s27, %s611_s11, %s611_s11, %s612_s18  }
 0x103 PF: > { %p469_p2 = scmp.ge.s32.totalorder %s605_s17, 2  ;;  %s371_s19 = sand.u32 1, %s585_s12  }
 0x104   : > { %s372_s15 = scalar_lea.sflag [#allocation3], %s371_s19 }
 0x105   : > { %p466_p3 = pnand %p469_p2, %p680_p8 }
 0x107   : > { %580 = dma.done.wait (!%p466_p3), %s372_s15, 768  }
 0x108   : > { %582 = vsyncadd (!%p466_p3), %s372_s15, 4294966528  ;;  %s16_s17 = sadd.s32 1, %s605_s17   ;;  %s767_s12 = smov %s589_s13 }
 0x109   : > { %p13_p5 = scmp.ge.s32.totalorder %s16_s17, 4   ;;  %s768_s13 = smov %s593_s14 }
 0x10a   : > { %s769_s14 = smov %s686_s25  ;;  %s770_s15 = smov %s601_s16 }
 0x10b   : > { %s771_s16 = smov %s773_s20  ;;  %15 = sbr.rel (!%p13_p5) target bundleno = 4 (0x4), region = 67 }
 0x112   :  { %377 = vsyncpa [#allocation3], 1 }
 0x113   :  { %379 = vsyncpa [#allocation3 + $0x1], 1 }

</bundles_post_ra>
